<compile_context>
chip_gen: v5e
topology: v5e:2x2
jax: 0.10.0
libtpu: 0.0.40
codegen_flags: <defaults>
</compile_context>

<pallas_src>
import functools

import jax
import jax.numpy as jnp
from jax.experimental import pallas as pl
from jax.experimental.pallas import tpu as pltpu


def _round_up(x, m):
    return ((x + m - 1) // m) * m


def actor_forward_kernel(x_ref,
                         w1_ref, b1_ref,
                         w2_ref, b2_ref,
                         w3_ref, b3_ref,
                         w4_ref, b4_ref,
                         out_ref,
                         *, act_size):
    """One batch tile of the MLP forward. Single lane-dense [tm, Npad] output.

    Shapes per grid step:
      x:  [tm, D]      w1: [D, H]   b1: [1, H]
      w2: [H, H]       b2: [1, H]
      w3: [H, H]       b3: [1, H]
      w4: [H, Npad]    b4: [1, Npad]   (Npad = 2*act_size zero-padded to a 128 multiple)
      out: [tm, Npad]  lanes [0, A) = mean, lanes [A, 2A) = clamped log_std
    """
    x = x_ref[...].astype(jnp.bfloat16)

    h = jnp.dot(x, w1_ref[...], preferred_element_type=jnp.float32) + b1_ref[...]
    h = jnp.maximum(h, 0.0)

    h = jnp.dot(h.astype(jnp.bfloat16), w2_ref[...],
                preferred_element_type=jnp.float32) + b2_ref[...]
    h = jnp.maximum(h, 0.0)

    h = jnp.dot(h.astype(jnp.bfloat16), w3_ref[...],
                preferred_element_type=jnp.float32) + b3_ref[...]
    h = jnp.maximum(h, 0.0)

    out = jnp.dot(h.astype(jnp.bfloat16), w4_ref[...],
                  preferred_element_type=jnp.float32) + b4_ref[...]

    # Clamp only the log_std lanes (lane index >= act_size); padded lanes are discarded
    # in the wrapper, so clamping them too is harmless.
    lane = jax.lax.broadcasted_iota(jnp.int32, out.shape, 1)
    clamped = jnp.clip(out, -20.0, 2.0)
    out_ref[...] = jnp.where(lane >= act_size, clamped, out)


def actor_forward(state, params, act_size, tm=None):
    """Wrapper: batch-tiled pallas_call; weights stay resident; split/slice outside."""
    B, D = state.shape
    w1, b1, w2, b2, w3, b3, w4, b4 = params
    H = w1.shape[1]
    Npad = w4.shape[1]  # already padded to a multiple of 128

    # Batch tile: multiple of 8 sublanes; amortize fixed per-step overhead for large B.
    if tm is None:
        tm = min(512, _round_up(B, 8))
    Bp = _round_up(B, tm)
    if Bp != B:
        state = jnp.pad(state, ((0, Bp - B), (0, 0)))

    grid = (Bp // tm,)

    def resident(shape):
        # Full-array block, constant index_map -> DMA'd once, stays in VMEM.
        return pl.BlockSpec(shape, lambda i: (0, 0))

    in_specs = [
        pl.BlockSpec((tm, D), lambda i: (i, 0)),      # x: batch-tiled
        resident(w1.shape), resident(b1.shape),
        resident(w2.shape), resident(b2.shape),
        resident(w3.shape), resident(b3.shape),
        resident(w4.shape), resident(b4.shape),
    ]
    out_spec = pl.BlockSpec((tm, Npad), lambda i: (i, 0))

    flops = 2 * Bp * (D * H + H * H + H * H + H * Npad)
    bytes_accessed = (
        state.size * state.dtype.itemsize
        + sum(p.size * p.dtype.itemsize for p in params)
        + Bp * Npad * 4
    )
    cost = pl.CostEstimate(flops=flops, transcendentals=0,
                           bytes_accessed=bytes_accessed)

    out = pl.pallas_call(
        functools.partial(actor_forward_kernel, act_size=act_size),
        out_shape=jax.ShapeDtypeStruct((Bp, Npad), jnp.float32),
        grid=grid,
        in_specs=in_specs,
        out_specs=out_spec,
        compiler_params=pltpu.CompilerParams(
            dimension_semantics=("parallel",)),
        cost_estimate=cost,
    )(state, w1, b1, w2, b2, w3, b3, w4, b4)

    mean = out[:B, :act_size]
    log_std = out[:B, act_size:2 * act_size]
    return mean, log_std


def init_actor_params(key, input_size, act_size, hidden_size, init_w=0.003):
    """Parameter init mirroring the PyTorch module.

    First three Linear layers: default PyTorch init U(-1/sqrt(fan_in), 1/sqrt(fan_in)).
    Last layer: U(-init_w, init_w) (as in MLP.__init__).
    Weights are stored as [in, out] (transposed vs. PyTorch's [out, in]), cast to bf16.
    The last layer's output dim is zero-padded from 2*act_size up to a 128 multiple so
    the final matmul / store are lane-dense.
    """
    ks = jax.random.split(key, 8)

    def lin(kw, kb, fan_in, fan_out, bound):
        w = jax.random.uniform(kw, (fan_in, fan_out), jnp.float32, -bound, bound)
        b = jax.random.uniform(kb, (1, fan_out), jnp.float32, -bound, bound)
        return w, b

    H = hidden_size
    w1, b1 = lin(ks[0], ks[1], input_size, H, 1.0 / float(jnp.sqrt(input_size)))
    w2, b2 = lin(ks[2], ks[3], H, H, 1.0 / float(jnp.sqrt(H)))
    w3, b3 = lin(ks[4], ks[5], H, H, 1.0 / float(jnp.sqrt(H)))
    w4, b4 = lin(ks[6], ks[7], H, act_size * 2, init_w)

    # Zero-pad last layer's output dim to a full 128-lane tile.
    Npad = max(128, _round_up(act_size * 2, 128))
    pad = Npad - act_size * 2
    w4 = jnp.pad(w4, ((0, 0), (0, pad)))
    b4 = jnp.pad(b4, ((0, 0), (0, pad)))

    # Weights in bf16 (halves dominant HBM traffic), biases stay f32.
    return (w1.astype(jnp.bfloat16), b1,
            w2.astype(jnp.bfloat16), b2,
            w3.astype(jnp.bfloat16), b3,
            w4.astype(jnp.bfloat16), b4)


def _ref_forward(state, params, act_size):
    """Pure-JAX reference using the same bf16-weight / f32-accumulate recipe."""
    w1, b1, w2, b2, w3, b3, w4, b4 = params
    h = state.astype(jnp.bfloat16)
    h = jnp.maximum(jnp.dot(h, w1, preferred_element_type=jnp.float32) + b1, 0.0)
    h = jnp.maximum(jnp.dot(h.astype(jnp.bfloat16), w2,
                            preferred_element_type=jnp.float32) + b2, 0.0)
    h = jnp.maximum(jnp.dot(h.astype(jnp.bfloat16), w3,
                            preferred_element_type=jnp.float32) + b3, 0.0)
    out = jnp.dot(h.astype(jnp.bfloat16), w4,
                  preferred_element_type=jnp.float32) + b4
    mean = out[:, :act_size]
    log_std = jnp.clip(out[:, act_size:2 * act_size], -20.0, 2.0)
    return mean, log_std


if __name__ == "__main__":
    # Small, TPU-friendly shapes: batch=8 (sublane), hidden=128 (lane), act=4.
    B, D, H, A = 8, 32, 128, 4

    key = jax.random.PRNGKey(0)
    k_params, k_state = jax.random.split(key)

    params = init_actor_params(k_params, input_size=D, act_size=A, hidden_size=H)
    state = jax.random.normal(k_state, (B, D), dtype=jnp.float32)

    mean, log_std = actor_forward(state, params, act_size=A)
    jax.block_until_ready((mean, log_std))

    ref_mean, ref_log_std = _ref_forward(state, params, act_size=A)

    assert mean.shape == (B, A) and log_std.shape == (B, A)
    assert jnp.allclose(mean, ref_mean, atol=1e-2, rtol=1e-2)
    assert jnp.allclose(log_std, ref_log_std, atol=1e-2, rtol=1e-2)

    print("KERNEL_OK")
</pallas_src>

<mosaic_0001>
module attributes {stable_mosaic.version = 11 : i64} {
  func.func @actor_forward_kernel(%arg0: i32, %arg1: memref<8x32xf32, #tpu.memory_space<vmem>>, %arg2: memref<32x128xbf16, #tpu.memory_space<vmem>>, %arg3: memref<1x128xf32, #tpu.memory_space<vmem>>, %arg4: memref<128x128xbf16, #tpu.memory_space<vmem>>, %arg5: memref<1x128xf32, #tpu.memory_space<vmem>>, %arg6: memref<128x128xbf16, #tpu.memory_space<vmem>>, %arg7: memref<1x128xf32, #tpu.memory_space<vmem>>, %arg8: memref<128x128xbf16, #tpu.memory_space<vmem>>, %arg9: memref<1x128xf32, #tpu.memory_space<vmem>>, %arg10: memref<8x128xf32, #tpu.memory_space<vmem>>) attributes {dimension_semantics = [#tpu.dimension_semantics<parallel>], iteration_bounds = array<i64: 1>, scalar_prefetch = 0 : i64, scratch_operands = 0 : i64, tpu.core_type = #tpu.core_type<tc>, window_params = [{transform_indices = @transform_0, window_bounds = array<i64: 8, 32>}, {pipeline_mode = #tpu.pipeline_mode<synchronous>, transform_indices = @transform_1, window_bounds = array<i64: 32, 128>}, {pipeline_mode = #tpu.pipeline_mode<synchronous>, transform_indices = @transform_2, window_bounds = array<i64: 1, 128>}, {pipeline_mode = #tpu.pipeline_mode<synchronous>, transform_indices = @transform_3, window_bounds = array<i64: 128, 128>}, {pipeline_mode = #tpu.pipeline_mode<synchronous>, transform_indices = @transform_4, window_bounds = array<i64: 1, 128>}, {pipeline_mode = #tpu.pipeline_mode<synchronous>, transform_indices = @transform_5, window_bounds = array<i64: 128, 128>}, {pipeline_mode = #tpu.pipeline_mode<synchronous>, transform_indices = @transform_6, window_bounds = array<i64: 1, 128>}, {pipeline_mode = #tpu.pipeline_mode<synchronous>, transform_indices = @transform_7, window_bounds = array<i64: 128, 128>}, {pipeline_mode = #tpu.pipeline_mode<synchronous>, transform_indices = @transform_8, window_bounds = array<i64: 1, 128>}, {transform_indices = @transform_9, window_bounds = array<i64: 8, 128>}]} {
    %c0 = arith.constant 0 : index
    %c0_0 = arith.constant 0 : index
    %0 = vector.load %arg1[%c0, %c0_0] : memref<8x32xf32, #tpu.memory_space<vmem>>, vector<8x32xf32>
    %1 = arith.truncf %0 : vector<8x32xf32> to vector<8x32xbf16>
    %c0_1 = arith.constant 0 : index
    %c0_2 = arith.constant 0 : index
    %2 = vector.load %arg2[%c0_1, %c0_2] : memref<32x128xbf16, #tpu.memory_space<vmem>>, vector<32x128xbf16>
    %cst = arith.constant dense<0.000000e+00> : vector<8x128xf32>
    %3 = tpu.matmul %1, %2, %cst {dimension_numbers = #tpu.dot_dimension_numbers<[1], [0], [0], [1], [0, 0, 1, 1], [], []>} : vector<8x32xbf16>, vector<32x128xbf16>, vector<8x128xf32> -> vector<8x128xf32>
    %c0_3 = arith.constant 0 : index
    %c0_4 = arith.constant 0 : index
    %4 = vector.load %arg3[%c0_3, %c0_4] : memref<1x128xf32, #tpu.memory_space<vmem>>, vector<1x128xf32>
    %5 = vector.broadcast %4 : vector<1x128xf32> to vector<8x128xf32>
    %6 = arith.addf %3, %5 : vector<8x128xf32>
    %cst_5 = arith.constant 0.000000e+00 : f32
    %7 = vector.broadcast %cst_5 : f32 to vector<8x128xf32>
    %8 = arith.maximumf %6, %7 : vector<8x128xf32>
    %9 = arith.truncf %8 : vector<8x128xf32> to vector<8x128xbf16>
    %c0_6 = arith.constant 0 : index
    %c0_7 = arith.constant 0 : index
    %10 = vector.load %arg4[%c0_6, %c0_7] : memref<128x128xbf16, #tpu.memory_space<vmem>>, vector<128x128xbf16>
    %cst_8 = arith.constant dense<0.000000e+00> : vector<8x128xf32>
    %11 = tpu.matmul %9, %10, %cst_8 {dimension_numbers = #tpu.dot_dimension_numbers<[1], [0], [0], [1], [0, 0, 1, 1], [], []>} : vector<8x128xbf16>, vector<128x128xbf16>, vector<8x128xf32> -> vector<8x128xf32>
    %c0_9 = arith.constant 0 : index
    %c0_10 = arith.constant 0 : index
    %12 = vector.load %arg5[%c0_9, %c0_10] : memref<1x128xf32, #tpu.memory_space<vmem>>, vector<1x128xf32>
    %13 = vector.broadcast %12 : vector<1x128xf32> to vector<8x128xf32>
    %14 = arith.addf %11, %13 : vector<8x128xf32>
    %cst_11 = arith.constant 0.000000e+00 : f32
    %15 = vector.broadcast %cst_11 : f32 to vector<8x128xf32>
    %16 = arith.maximumf %14, %15 : vector<8x128xf32>
    %17 = arith.truncf %16 : vector<8x128xf32> to vector<8x128xbf16>
    %c0_12 = arith.constant 0 : index
    %c0_13 = arith.constant 0 : index
    %18 = vector.load %arg6[%c0_12, %c0_13] : memref<128x128xbf16, #tpu.memory_space<vmem>>, vector<128x128xbf16>
    %cst_14 = arith.constant dense<0.000000e+00> : vector<8x128xf32>
    %19 = tpu.matmul %17, %18, %cst_14 {dimension_numbers = #tpu.dot_dimension_numbers<[1], [0], [0], [1], [0, 0, 1, 1], [], []>} : vector<8x128xbf16>, vector<128x128xbf16>, vector<8x128xf32> -> vector<8x128xf32>
    %c0_15 = arith.constant 0 : index
    %c0_16 = arith.constant 0 : index
    %20 = vector.load %arg7[%c0_15, %c0_16] : memref<1x128xf32, #tpu.memory_space<vmem>>, vector<1x128xf32>
    %21 = vector.broadcast %20 : vector<1x128xf32> to vector<8x128xf32>
    %22 = arith.addf %19, %21 : vector<8x128xf32>
    %cst_17 = arith.constant 0.000000e+00 : f32
    %23 = vector.broadcast %cst_17 : f32 to vector<8x128xf32>
    %24 = arith.maximumf %22, %23 : vector<8x128xf32>
    %25 = arith.truncf %24 : vector<8x128xf32> to vector<8x128xbf16>
    %c0_18 = arith.constant 0 : index
    %c0_19 = arith.constant 0 : index
    %26 = vector.load %arg8[%c0_18, %c0_19] : memref<128x128xbf16, #tpu.memory_space<vmem>>, vector<128x128xbf16>
    %cst_20 = arith.constant dense<0.000000e+00> : vector<8x128xf32>
    %27 = tpu.matmul %25, %26, %cst_20 {dimension_numbers = #tpu.dot_dimension_numbers<[1], [0], [0], [1], [0, 0, 1, 1], [], []>} : vector<8x128xbf16>, vector<128x128xbf16>, vector<8x128xf32> -> vector<8x128xf32>
    %c0_21 = arith.constant 0 : index
    %c0_22 = arith.constant 0 : index
    %28 = vector.load %arg9[%c0_21, %c0_22] : memref<1x128xf32, #tpu.memory_space<vmem>>, vector<1x128xf32>
    %29 = vector.broadcast %28 : vector<1x128xf32> to vector<8x128xf32>
    %30 = arith.addf %27, %29 : vector<8x128xf32>
    %31 = tpu.iota {dimensions = array<i32: 1>} : vector<8x128xi32>
    %cst_23 = arith.constant -2.000000e+01 : f32
    %cst_24 = arith.constant 2.000000e+00 : f32
    %32 = vector.broadcast %cst_23 : f32 to vector<8x128xf32>
    %33 = arith.maximumf %32, %30 : vector<8x128xf32>
    %34 = vector.broadcast %cst_24 : f32 to vector<8x128xf32>
    %35 = arith.minimumf %34, %33 : vector<8x128xf32>
    %c4_i32 = arith.constant 4 : i32
    %36 = vector.broadcast %c4_i32 : i32 to vector<8x128xi32>
    %37 = arith.cmpi sge, %31, %36 : vector<8x128xi32>
    %38 = arith.select %37, %35, %30 : vector<8x128xi1>, vector<8x128xf32>
    %c0_25 = arith.constant 0 : index
    %c0_26 = arith.constant 0 : index
    %39 = vector.load %arg10[%c0_25, %c0_26] : memref<8x128xf32, #tpu.memory_space<vmem>>, vector<8x128xf32>
    tpu.vector_store %arg10[%c0_25, %c0_26], %38 {strides = array<i32>} : memref<8x128xf32, #tpu.memory_space<vmem>>, vector<8x128xf32>,
    return
  }
  func.func @transform_0(%arg0: i32) -> (i32, i32) {
    %c0_i32 = arith.constant 0 : i32
    %c0_i32_0 = arith.constant 0 : i32
    return %arg0, %c0_i32 : i32, i32
  }
  func.func @transform_1(%arg0: i32) -> (i32, i32) {
    %c0_i32 = arith.constant 0 : i32
    %c0_i32_0 = arith.constant 0 : i32
    %c0_i32_1 = arith.constant 0 : i32
    return %c0_i32, %c0_i32_0 : i32, i32
  }
  func.func @transform_2(%arg0: i32) -> (i32, i32) {
    %c0_i32 = arith.constant 0 : i32
    %c0_i32_0 = arith.constant 0 : i32
    %c0_i32_1 = arith.constant 0 : i32
    return %c0_i32, %c0_i32_0 : i32, i32
  }
  func.func @transform_3(%arg0: i32) -> (i32, i32) {
    %c0_i32 = arith.constant 0 : i32
    %c0_i32_0 = arith.constant 0 : i32
    %c0_i32_1 = arith.constant 0 : i32
    return %c0_i32, %c0_i32_0 : i32, i32
  }
  func.func @transform_4(%arg0: i32) -> (i32, i32) {
    %c0_i32 = arith.constant 0 : i32
    %c0_i32_0 = arith.constant 0 : i32
    %c0_i32_1 = arith.constant 0 : i32
    return %c0_i32, %c0_i32_0 : i32, i32
  }
  func.func @transform_5(%arg0: i32) -> (i32, i32) {
    %c0_i32 = arith.constant 0 : i32
    %c0_i32_0 = arith.constant 0 : i32
    %c0_i32_1 = arith.constant 0 : i32
    return %c0_i32, %c0_i32_0 : i32, i32
  }
  func.func @transform_6(%arg0: i32) -> (i32, i32) {
    %c0_i32 = arith.constant 0 : i32
    %c0_i32_0 = arith.constant 0 : i32
    %c0_i32_1 = arith.constant 0 : i32
    return %c0_i32, %c0_i32_0 : i32, i32
  }
  func.func @transform_7(%arg0: i32) -> (i32, i32) {
    %c0_i32 = arith.constant 0 : i32
    %c0_i32_0 = arith.constant 0 : i32
    %c0_i32_1 = arith.constant 0 : i32
    return %c0_i32, %c0_i32_0 : i32, i32
  }
  func.func @transform_8(%arg0: i32) -> (i32, i32) {
    %c0_i32 = arith.constant 0 : i32
    %c0_i32_0 = arith.constant 0 : i32
    %c0_i32_1 = arith.constant 0 : i32
    return %c0_i32, %c0_i32_0 : i32, i32
  }
  func.func @transform_9(%arg0: i32) -> (i32, i32) {
    %c0_i32 = arith.constant 0 : i32
    %c0_i32_0 = arith.constant 0 : i32
    return %arg0, %c0_i32 : i32, i32
  }
}

</mosaic_0001>

<bundles_post_ra>
// kernel: tpu_custom_call.1
= control target key start
LH: loop header
LB: loop body
LE: loop exit
PB: predicated region body
PF: predicated region fallthrough
CT: control target
= control target key end

     0   :  { %14 = vsyncpa [#allocation3], 0  ;;  %s807_s0 = inlined_call_operand.hbm [shape: f32[8,32], index: 0, kind: input, shape index: {}]   ;;  %s808_s1 = inlined_call_operand.hbm [shape: bf16[32,128], index: 1, kind: input, shape index: {}]   ;;  %s809_s2 = inlined_call_operand.vmem [shape: f32[1,128], index: 2, kind: input, shape index: {}]   ;;  %s810_s3 = inlined_call_operand.hbm [shape: bf16[128,128], index: 3, kind: input, shape index: {}]   ;;  %s811_s4 = inlined_call_operand.vmem [shape: f32[1,128], index: 4, kind: input, shape index: {}]   ;;  %s812_s5 = inlined_call_operand.hbm [shape: bf16[128,128], index: 5, kind: input, shape index: {}]   ;;  %s813_s6 = inlined_call_operand.vmem [shape: f32[1,128], index: 6, kind: input, shape index: {}]   ;;  %s814_s7 = inlined_call_operand.hbm [shape: bf16[128,128], index: 7, kind: input, shape index: {}]   ;;  %s815_s8 = inlined_call_operand.vmem [shape: f32[1,128], index: 8, kind: input, shape index: {}]   ;;  %s816_s9 = inlined_call_operand.hbm [shape: f32[8,128], index: 9, kind: output, shape index: {}]  }
   0x1   :  { %15 = vsyncpa [#allocation6], 0 }
   0x2   :  { %16 = vsyncpa [#allocation9], 0  ;;  %s33_s11 = sshll.u32 %s808_s1, 4  ;;  %s34_s11 = int_to_ptr.hbm [resolvable:$true] %s33_s11 }
   0x3   :  { %17 = vsyncpa [#allocation4], 0  ;;  %s719_s12 = smov [#allocation5]   ;;  %s63_s16 = sshll.u32 %s812_s5, 4  ;;  %s64_s16 = int_to_ptr.hbm [resolvable:$true] %s63_s16 }
   0x4   :  { %s35_s13 = sshll.u32 %s719_s12, 4  ;;  %s720_s17 = smov 64   ;;  %s36_s13 = int_to_ptr.vmem [resolvable:$true] %s35_s13 }
   0x5   :  { %s721_s18 = smov 4   ;;  %s722_s19 = smov [#allocation8]  }
   0x6   :  { %41 = dma.hbm_to_vmem [thread:$0]  %s34_s11, 256, %s36_s13, [#allocation6], %s720_s17, %s720_s17, %s721_s18  }
   0x7   :  { %s65_s20 = sshll.u32 %s722_s19, 4  ;;  %s23_s23 = sshll.u32 %s807_s0, 4  ;;  %s66_s20 = int_to_ptr.vmem [resolvable:$true] %s65_s20  ;;  %s24_s23 = int_to_ptr.hbm [resolvable:$true] %s23_s23 }
   0x8   :  { %71 = dma.hbm_to_vmem [thread:$0]  %s64_s16, 1024, %s66_s20, [#allocation9], %s720_s17, %s720_s17, %s721_s18  }
   0x9   :  { %s48_s25 = sshll.u32 %s810_s3, 4  ;;  %s723_s26 = smov [#allocation2]   ;;  %s49_s25 = int_to_ptr.hbm [resolvable:$true] %s48_s25 }
   0xa   :  { %s25_s27 = sshll.u32 %s723_s26, 4  ;;  %s724_s5 = smov [#allocation7]   ;;  %s26_s27 = int_to_ptr.vmem [resolvable:$true] %s25_s27 }
   0xb   :  { %28 = dma.hbm_to_vmem [thread:$0]  %s24_s23, 128, %s26_s27, [#allocation3]  }
   0xc   :  { %s50_s28 = sshll.u32 %s724_s5, 4  ;;  %s78_s10 = sshll.u32 %s814_s7, 4  ;;  %s51_s28 = int_to_ptr.vmem [resolvable:$true] %s50_s28  ;;  %s79_s10 = int_to_ptr.hbm [resolvable:$true] %s78_s10 }
   0xd   :  { %56 = dma.hbm_to_vmem [thread:$0]  %s49_s25, 1024, %s51_s28, [#allocation6], %s720_s17, %s720_s17, %s721_s18  }
   0xe   :  { %s725_s0 = smov [#allocation10]  }
   0xf   :  { %s80_s11 = sshll.u32 %s725_s0, 4  ;;  %s81_s11 = int_to_ptr.vmem [resolvable:$true] %s80_s11 }
  0x10   :  { %86 = dma.hbm_to_vmem [thread:$0]  %s79_s10, 1024, %s81_s11, [#allocation9], %s720_s17, %s720_s17, %s721_s18  }
  0x11   :  { %711 = dma.done.wait [#allocation3], 128  }
  0x12   :  { %712 = vsyncadd [#allocation3], 4294967168 }
  0x13   :  { %713 = dma.done.wait [#allocation6], 1280  }
  0x14   :  { %714 = vsyncadd [#allocation6], 4294966016 }
  0x15   :  { %715 = dma.done.wait [#allocation9], 2048  }
  0x16   :  { %716 = vsyncadd [#allocation9], 4294965248  ;;  %v530_v0 = vld [vmem:[#allocation5 + $0x8] sm:$0xff]  ;;  %v529_v2 = vld [vmem:[#allocation5] sm:$0xff]  ;;  %vm132_vm0 = vcmask 261120   ;;  %v398_v46 = vlaneseq  ;;  %s726_s16 = smov [#allocation11]  }
  0x17   :  { %v538_v1 = vld [vmem:[#allocation7 + $0x38] sm:$0xff]  ;;  %142 = vmatpush.bf16.msra.mxu0 %v530_v0  ;;  %v110_v3 = vld [vmem:[#allocation2] sm:$0xff]  ;;  %v537_v4 = vld [vmem:[#allocation7 + $0x30] sm:$0xff]  ;;  %s410_s17 = sshll.u32 %s726_s16, 4  ;;  %s411_s17 = int_to_ptr.vmem [resolvable:$true] %s410_s17 }
  0x18   :  { %219 = vmatpush.bf16.msra.mxu1 %v538_v1  ;;  %v111_v5 = vpack.c.bf16 %v110_v3, %v110_v3  ;;  %v536_v6 = vld [vmem:[#allocation7 + $0x28] sm:$0xff]  ;;  %v535_v7 = vld [vmem:[#allocation7 + $0x20] sm:$0xff]  ;;  %v534_v8 = vld [vmem:[#allocation7 + $0x18] sm:$0xff]  ;;  %v399_v49 = vand.u32 127, %v398_v46 }
  0x19   :  { %v533_v9 = vld [vmem:[#allocation7 + $0x10] sm:$0xff]  ;;  %v532_v10 = vld [vmem:[#allocation7 + $0x8] sm:$0xff]  ;;  %v531_v11 = vld [vmem:[#allocation7] sm:$0xff] }
  0x1a   :  { %v546_v12 = vld [vmem:[#allocation8 + $0x38] sm:$0xff]  ;;  %v545_v13 = vld [vmem:[#allocation8 + $0x30] sm:$0xff]  ;;  %v544_v14 = vld [vmem:[#allocation8 + $0x28] sm:$0xff]  ;;  %vm402_vm1 = vcmp.ge.s32.totalorder %v399_v49, 4 }
  0x1b   :  { %143 = vmatpush.bf16.msra.mxu0 %v529_v2  ;;  %302 = vmatpush.bf16.msra.mxu2 %v546_v12  ;;  %v543_v15 = vld [vmem:[#allocation8 + $0x20] sm:$0xff]  ;;  %v542_v16 = vld [vmem:[#allocation8 + $0x18] sm:$0xff]  ;;  %v541_v17 = vld [vmem:[#allocation8 + $0x10] sm:$0xff] }
  0x1c   :  { %220 = vmatpush.bf16.msra.mxu1 %v537_v4  ;;  %v563_v18 = vld [vmem:[%s809_s2] ss:$0 sm:$0xff]  ;;  %v539_v25 = vld [vmem:[#allocation8] sm:$0xff]  ;;  %v554_v26 = vld [vmem:[#allocation10 + $0x38] sm:$0xff] }
  0x1d   :  { %v540_v24 = vld [vmem:[#allocation8 + $0x8] sm:$0xff]  ;;  %385 = vmatpush.bf16.msra.mxu3 %v554_v26  ;;  %v553_v27 = vld [vmem:[#allocation10 + $0x30] sm:$0xff]  ;;  %v551_v29 = vld [vmem:[#allocation10 + $0x20] sm:$0xff] }
  0x1e   :  { %432 = vmatmul.msk.bf16.vlgmr.msra.gmra.mxu0 %vm132_vm0, %v111_v5  ;;  %v552_v28 = vld [vmem:[#allocation10 + $0x28] sm:$0xff]  ;;  %v550_v30 = vld [vmem:[#allocation10 + $0x18] sm:$0xff]  ;;  %v549_v31 = vld [vmem:[#allocation10 + $0x10] sm:$0xff] }
  0x1f   :  { %303 = vmatpush.bf16.msra.mxu2 %v545_v13  ;;  %v564_v32 = vld [vmem:[%s811_s4] ss:$0 sm:$0xff]  ;;  %v547_v39 = vld [vmem:[#allocation10] sm:$0xff] }
  0x20   :  { %221 = vmatpush.bf16.msra.mxu1 %v536_v6  ;;  %v548_v38 = vld [vmem:[#allocation10 + $0x8] sm:$0xff] }
  0x21   :  { %386 = vmatpush.bf16.msra.mxu3 %v553_v27  ;;  %v565_v40 = vld [vmem:[%s813_s6] ss:$0 sm:$0xff]  ;;  %s412_s6 = sshll.u32 %s816_s9, 4  ;;  %s413_s6 = int_to_ptr.hbm [resolvable:$true] %s412_s6 }
  0x22   :  { %v566_v47 = vld [vmem:[%s815_s8] ss:$0 sm:$0xff] }
  0x23   :  { %304 = vmatpush.bf16.msra.mxu2 %v544_v14 }
  0x24   :  { %222 = vmatpush.bf16.msra.mxu1 %v535_v7 }
  0x25   :  { %387 = vmatpush.bf16.msra.mxu3 %v552_v28 }
  0x27   :  { %305 = vmatpush.bf16.msra.mxu2 %v543_v15 }
  0x28   :  { %223 = vmatpush.bf16.msra.mxu1 %v534_v8 }
  0x29   :  { %388 = vmatpush.bf16.msra.mxu3 %v551_v29 }
  0x2b   :  { %306 = vmatpush.bf16.msra.mxu2 %v542_v16 }
  0x2c   :  { %224 = vmatpush.bf16.msra.mxu1 %v533_v9 }
  0x2d   :  { %389 = vmatpush.bf16.msra.mxu3 %v550_v30 }
  0x2f   :  { %307 = vmatpush.bf16.msra.mxu2 %v541_v17 }
  0x30   :  { %225 = vmatpush.bf16.msra.mxu1 %v532_v10 }
  0x31   :  { %390 = vmatpush.bf16.msra.mxu3 %v549_v31 }
  0x33   :  { %308 = vmatpush.bf16.msra.mxu2 %v540_v24 }
  0x34   :  { %226 = vmatpush.bf16.msra.mxu1 %v531_v11 }
  0x35   :  { %391 = vmatpush.bf16.msra.mxu3 %v548_v38 }
  0x37   :  { %309 = vmatpush.bf16.msra.mxu2 %v539_v25 }
  0x39   :  { %392 = vmatpush.bf16.msra.mxu3 %v547_v39 }
  0x9b   :  { %v145_v19 = vpop.f32.mrf.mxu0 }
  0x9c   :  { %v146_v20 = vadd.f32 %v563_v18, %v145_v19 }
  0x9e   :  { %v149_v21 = vmax.f32 %v146_v20, 0.0 }
  0xa0   :  { %v150_v22 = vpack.c.bf16 %v149_v21, %v149_v21 }
  0xa2   :  { %227 = vmatmul.bf16.vlgmr.msra.gmra.mxu1 %v150_v22 }
  0xa3   :  { %v147_v23 = vpop.f32.mrf.mxu0 }
 0x11f   :  { %v228_v33 = vpop.f32.mrf.mxu1 }
 0x120   :  { %v229_v34 = vadd.f32 %v564_v32, %v228_v33 }
 0x122   :  { %v232_v35 = vmax.f32 %v229_v34, 0.0 }
 0x124   :  { %v233_v36 = vpack.c.bf16 %v232_v35, %v232_v35 }
 0x126   :  { %310 = vmatmul.bf16.vlgmr.msra.gmra.mxu2 %v233_v36 }
 0x127   :  { %v230_v37 = vpop.f32.mrf.mxu1 }
 0x1a9   :  { %v311_v41 = vpop.f32.mrf.mxu2 }
 0x1aa   :  { %v312_v42 = vadd.f32 %v565_v40, %v311_v41 }
 0x1ac   :  { %v315_v43 = vmax.f32 %v312_v42, 0.0 }
 0x1ae   :  { %v316_v44 = vpack.c.bf16 %v315_v43, %v315_v43 }
 0x1b0   :  { %393 = vmatmul.bf16.vlgmr.msra.gmra.mxu3 %v316_v44 }
 0x1b1   :  { %v313_v45 = vpop.f32.mrf.mxu2 }
 0x233   :  { %v394_v48 = vpop.f32.mrf.mxu3 }
 0x234   :  { %v395_v50 = vadd.f32 %v566_v47, %v394_v48 }
 0x236   :  { %v400_v51 = vmax.f32 %v395_v50, -20.0 }
 0x238   :  { %v401_v52 = vmin.f32 %v400_v51, 2.0 }
 0x23a   :  { %v403_v53 = vsel %vm402_vm1, %v401_v52, %v395_v50 }
 0x23b   :  { %v396_v54 = vpop.f32.mrf.mxu3  ;;  %404 = vst [vmem:[#allocation11] sm:$0xff] %v403_v53 }
 0x23c   :  { %415 = dma.vmem_to_hbm [thread:$0]  %s411_s17, 128, %s413_s6, [#allocation4]  }
 0x23d   :  { %717 = dma.done.wait [#allocation4], 128  }
 0x23e   :  { %718 = vsyncadd [#allocation4], 4294967168 }
 0x23f   :  { %420 = vsyncpa [#allocation3], 1 }
 0x240   :  { %421 = vsyncpa [#allocation6], 1 }
 0x241   :  { %422 = vsyncpa [#allocation9], 1 }
 0x242   :  { %423 = vsyncpa [#allocation4], 1 }

</bundles_post_ra>
